<compile_context>
chip_gen: v7x
topology: tpu7x:2x2x1
jax: 0.10.0
libtpu: 0.0.40
codegen_flags: <defaults>
</compile_context>

<pallas_src>
import functools

import jax
import jax.numpy as jnp
from jax.experimental import pallas as pl
from jax.experimental.pallas import tpu as pltpu

NEG_SLOPE = 0.01  # torch.nn.LeakyReLU default


def _round_up(n, m):
    return ((n + m - 1) // m) * m


def _next_pow2(n):
    p = 1
    while p < n:
        p *= 2
    return p


def _pairwise_fold(v, n_blocks, block_width, op):
    """Pairwise-fold `op` across `n_blocks` (a power of two) consecutive blocks
    of `block_width` lanes of `v`.  Lanes past the real data must already hold
    the identity of `op`.  Uses pltpu.roll (XLU) instead of lane slices +
    concatenates; the reduction lands in lanes [0, block_width)."""
    width = v.shape[-1]
    cur = n_blocks
    while cur > 1:
        half = cur // 2
        # jnp.roll semantics: rolled[i] = v[(i + half*block_width) mod width]
        rolled = pltpu.roll(v, width - half * block_width, axis=1)
        v = op(v, rolled)
        cur = half
    return v


def _crl_kernel(x_ref, c_ref, w1_ref, b1_ref, *rest, emb_size, n_concepts,
                n_classes, temperature, split_w2, n_fold_blocks, fold_width,
                out_width):
    """One batch tile.  Column layout of all (TB, C*K) tensors is concept-major
    (col = concept * n_classes + class), i.e. PyTorch's .view(B, C, K) order."""
    E, C, K = emb_size, n_concepts, n_classes
    CK = C * K

    if split_w2:
        (w2s_ref, w2f_ref, b2s_ref, b2f_ref,
         brd_ref, seg_ref, segt_ref, out_ref) = rest
    else:
        w2_ref, b2_ref, brd_ref, seg_ref, segt_ref, out_ref = rest

    x = x_ref[...]                      # (TB, E)   matmul dtype
    c = c_ref[...]                      # (TB, C)   f32

    # ---- fused first layer (sign || filter): one MXU matmul, f32 accumulate --
    h = jnp.dot(x, w1_ref[...], preferred_element_type=jnp.float32) + b1_ref[...]
    h = jnp.maximum(h, NEG_SLOPE * h)   # LeakyReLU as a single VPU max
    h = h.astype(w1_ref.dtype)          # back to the MXU-native matmul dtype

    # ---- second layer ---------------------------------------------------------
    if split_w2:
        # E >= 128: lane-aligned halves, two matmuls (no zero-padded FLOPs /
        # doubled weight VMEM).
        s_logits = (jnp.dot(h[:, :E], w2s_ref[...],
                            preferred_element_type=jnp.float32) + b2s_ref[...])
        f_logits = (jnp.dot(h[:, E:], w2f_ref[...],
                            preferred_element_type=jnp.float32) + b2f_ref[...])
    else:
        # E < 128: block-diagonal fused second layer (MXU pads to 128 anyway).
        logits = (jnp.dot(h, w2_ref[...], preferred_element_type=jnp.float32)
                  + b2_ref[...])
        s_logits = logits[:, :CK]       # sign_nn output
        f_logits = logits[:, CK:]       # filter_nn output

    # ---- polarity: full-width sigmoid (EUP) -----------------------------------
    sign_attn = jax.nn.sigmoid(s_logits)                          # (TB, CK)

    # c broadcast to every class (concept-major) via exact 0/1 indicator matmul
    c_rep = jnp.dot(c, brd_ref[...], preferred_element_type=jnp.float32)

    # ---- softselect over concepts, algebraically folded -----------------------
    #   soft = f - rep[(1-T)*lse_k + (T/C)*colsum_k(f)]
    # T == 1 (default): no max / exp / log / logsumexp at all.
    colsum = jnp.dot(f_logits, seg_ref[...],
                     preferred_element_type=jnp.float32)          # (TB, K)
    if temperature == 1.0:
        per_class = colsum * (1.0 / C)
    else:
        # general T: safe per-class logsumexp (true per-class max via roll fold)
        tb = f_logits.shape[0]
        pad = fold_width - CK
        fpad = f_logits
        if pad:
            fpad = jnp.concatenate(
                [f_logits, jnp.full((tb, pad), -3.0e38, jnp.float32)], axis=-1)
        mclass = _pairwise_fold(fpad, n_fold_blocks, K, jnp.maximum)[:, :K]
        m_rep = jnp.dot(mclass, segt_ref[...],
                        preferred_element_type=jnp.float32)       # (TB, CK)
        e = jnp.exp(f_logits - m_rep)
        lse = mclass + jnp.log(
            jnp.dot(e, seg_ref[...], preferred_element_type=jnp.float32))
        per_class = (1.0 - temperature) * lse + (temperature / C) * colsum

    rep = jnp.dot(per_class, segt_ref[...],
                  preferred_element_type=jnp.float32)             # (TB, CK)
    neg_filter = jax.nn.sigmoid(rep - f_logits)   # = 1 - sigmoid(soft)

    # ---- Goedel logic, full lane width (VPU) ----------------------------------
    sign_terms = jnp.minimum(jnp.maximum(1.0 - sign_attn, c_rep),
                             jnp.maximum(sign_attn, 1.0 - c_rep))
    filtered = jnp.maximum(sign_terms, neg_filter)                # (TB, CK)

    # ---- conj over concepts: roll-based pairwise-min fold ---------------------
    tb = filtered.shape[0]
    pad = fold_width - CK
    if pad:
        # 1.0 is the min identity (all operands live in [0, 1])
        filtered = jnp.concatenate(
            [filtered, jnp.full((tb, pad), 1.0, jnp.float32)], axis=-1)
    v = _pairwise_fold(filtered, n_fold_blocks, K, jnp.minimum)

    out_ref[...] = v[:, :out_width]     # single lane-dense (TB, 128k) store


def prepare_params(params, *, emb_size, n_concepts, n_classes,
                   matmul_dtype=jnp.bfloat16):
    """One-time weight glue (do NOT call per forward step): fuse the two
    first-layer Linears, pick the second-layer layout by emb_size, build the
    0/1 indicator matrices, and cast matmul operands to the MXU dtype."""
    w1s, b1s, w2s, b2s, w1f, b1f, w2f, b2f = params
    E, C, K = emb_size, n_concepts, n_classes
    CK = C * K
    split_w2 = E >= 128

    w1_cat = jnp.concatenate([w1s, w1f], axis=1).astype(matmul_dtype)  # (E, 2E)
    b1_cat = jnp.concatenate([b1s, b1f], axis=1).astype(jnp.float32)   # (1, 2E)

    col = jnp.arange(CK)
    # c broadcast matrix: brd[j, col] = 1 iff col // K == j              (C, CK)
    brd = (col[None, :] // K == jnp.arange(C)[:, None]).astype(jnp.float32)
    # per-class segment-sum matrix: seg[col, k] = 1 iff col % K == k     (CK, K)
    seg = (col[:, None] % K == jnp.arange(K)[None, :]).astype(jnp.float32)
    segt = jnp.asarray(seg.T)                                           # (K, CK)

    if split_w2:
        w2_group = (w2s.astype(matmul_dtype), w2f.astype(matmul_dtype),
                    b2s.astype(jnp.float32), b2f.astype(jnp.float32))
    else:
        w2_blk = jnp.zeros((2 * E, 2 * CK), matmul_dtype)               # block diag
        w2_blk = (w2_blk.at[:E, :CK].set(w2s.astype(matmul_dtype))
                         .at[E:, CK:].set(w2f.astype(matmul_dtype)))
        b2_cat = jnp.concatenate([b2s, b2f], axis=1).astype(jnp.float32)
        w2_group = (w2_blk, b2_cat)

    return (w1_cat, b1_cat) + w2_group + (brd, seg, segt)


def crl_forward(x, c, prepped, *, n_concepts, n_classes, temperature=1.0,
                batch_tile=256):
    """Pallas implementation of ConceptReasoningLayer.forward (default flags)."""
    B, E = x.shape
    C, K = n_concepts, n_classes
    CK = C * K
    split_w2 = E >= 128     # must match prepare_params

    if split_w2:
        w1, b1, w2s, w2f, b2s, b2f, brd, seg, segt = prepped
        w2_group = (w2s, w2f, b2s, b2f)
    else:
        w1, b1, w2b, b2, brd, seg, segt = prepped
        w2_group = (w2b, b2)

    mm_dtype = w1.dtype
    itemsize = jnp.dtype(mm_dtype).itemsize
    x = x.astype(mm_dtype)              # halves x-tile DMA bytes when bf16
    c = c.astype(jnp.float32)

    # Batch tiling: sublane-aligned for the matmul dtype; capped so a v7x
    # megacore always gets >= 2 grid steps (neutral on v5e/v6e).
    row_mult = 8 * max(1, 4 // itemsize)
    TB = min(batch_tile, _round_up(pl.cdiv(B, 2), row_mult),
             _round_up(B, row_mult))
    Bp = _round_up(B, TB)
    if Bp != B:
        x = jnp.pad(x, ((0, Bp - B), (0, 0)))
        c = jnp.pad(c, ((0, Bp - B), (0, 0)))
    grid = (Bp // TB,)

    # Lane geometry for the conj fold and the lane-dense output store.
    out_width = _round_up(K, 128)
    n_fold_blocks = _next_pow2(C)
    fold_width = _round_up(max(n_fold_blocks * K, out_width), 128)

    kernel = functools.partial(
        _crl_kernel, emb_size=E, n_concepts=C, n_classes=K,
        temperature=float(temperature), split_w2=split_w2,
        n_fold_blocks=n_fold_blocks, fold_width=fold_width,
        out_width=out_width)

    def resident(arr):  # whole array as one VMEM-resident block across the grid
        return pl.BlockSpec(arr.shape, lambda *_: (0,) * arr.ndim)

    params = (w1, b1) + w2_group + (brd, seg, segt)
    in_specs = ([pl.BlockSpec((TB, E), lambda i: (i, 0)),      # x tile
                 pl.BlockSpec((TB, C), lambda i: (i, 0))]      # c tile
                + [resident(a) for a in params])
    out_specs = pl.BlockSpec((TB, out_width), lambda i: (i, 0))

    # Advisory cost estimate + VMEM budget (explicit limit only when the
    # default 32 MiB scoped ceiling would be exceeded; capped v7x-safe).
    second_flops = 2 * E * CK if split_w2 else (2 * E) * (2 * CK)
    flops = 2 * Bp * (E * 2 * E + second_flops + C * CK + 2 * CK * K)
    param_bytes = sum(a.size * a.dtype.itemsize for a in params)
    tile_bytes = TB * (E * itemsize + 4 * C + 4 * out_width)
    cost = pl.CostEstimate(
        flops=flops,
        transcendentals=Bp * 2 * CK,
        bytes_accessed=int(Bp * (E * itemsize + 4 * C + 4 * out_width)
                           + param_bytes))
    vmem_est = 2 * (param_bytes + tile_bytes) + 14 * TB * max(CK, fold_width) * 4
    vmem_limit = None
    if vmem_est > 32 * 2 ** 20:
        vmem_limit = min(int(vmem_est * 5 // 4), 60 * 2 ** 20)

    out = pl.pallas_call(
        kernel,
        out_shape=jax.ShapeDtypeStruct((Bp, out_width), jnp.float32),
        grid=grid,
        in_specs=in_specs,
        out_specs=out_specs,
        compiler_params=pltpu.CompilerParams(
            dimension_semantics=("parallel",),            # megacore on v7x
            vmem_limit_bytes=vmem_limit),
        cost_estimate=cost,
    )(x, c, *params)

    return out[:B, :K]


def crl_reference(x, c, params, *, n_concepts, n_classes, temperature=1.0):
    """Plain-JAX f32 reference mirroring the PyTorch forward exactly."""
    w1s, b1s, w2s, b2s, w1f, b1f, w2f, b2f = params
    B = x.shape[0]

    def mlp(v, w1, b1, w2, b2):
        h = v @ w1 + b1
        h = jnp.where(h > 0, h, NEG_SLOPE * h)
        return h @ w2 + b2

    sign_attn = jax.nn.sigmoid(mlp(x, w1s, b1s, w2s, b2s)).reshape(
        B, n_concepts, n_classes)
    filtr = mlp(x, w1f, b1f, w2f, b2f).reshape(B, n_concepts, n_classes)

    log_sm = jax.nn.log_softmax(filtr, axis=1)
    soft = log_sm - temperature * jnp.mean(log_sm, axis=1, keepdims=True)
    filter_attn = jax.nn.sigmoid(soft)

    values = jnp.broadcast_to(c[:, :, None], (B, n_concepts, n_classes))
    sign_terms = jnp.minimum(jnp.maximum(1.0 - sign_attn, values),
                             jnp.maximum(sign_attn, 1.0 - values))
    filtered = jnp.maximum(sign_terms, 1.0 - filter_attn)
    return jnp.min(filtered, axis=1)


def _init_module_params(key, emb, n_concepts, n_classes):
    def linear_init(k, fan_in, fan_out):
        kw, kb = jax.random.split(k)
        bound = 1.0 / (fan_in ** 0.5)
        w = jax.random.uniform(kw, (fan_in, fan_out), jnp.float32, -bound, bound)
        b = jax.random.uniform(kb, (1, fan_out), jnp.float32, -bound, bound)
        return w, b

    ks = jax.random.split(key, 4)
    w1s, b1s = linear_init(ks[0], emb, emb)
    w2s, b2s = linear_init(ks[1], emb, n_concepts * n_classes)
    w1f, b1f = linear_init(ks[2], emb, emb)
    w2f, b2f = linear_init(ks[3], emb, n_concepts * n_classes)
    return (w1s, b1s, w2s, b2s, w1f, b1f, w2f, b2f)


def _run_case(key, *, B, emb, C, K, temperature, matmul_dtype, atol, rtol=0.0):
    kx, kc, kp = jax.random.split(key, 3)
    x = jax.random.normal(kx, (B, emb), jnp.float32)
    c = jax.random.uniform(kc, (B, C), dtype=jnp.float32)   # concepts in [0, 1]
    params = _init_module_params(kp, emb, C, K)

    prepped = jax.tree_util.tree_map(
        jax.block_until_ready,
        prepare_params(params, emb_size=emb, n_concepts=C, n_classes=K,
                       matmul_dtype=matmul_dtype))

    fwd = jax.jit(functools.partial(crl_forward, n_concepts=C, n_classes=K,
                                    temperature=temperature))
    preds = jax.block_until_ready(fwd(x, c, prepped))
    ref = crl_reference(x, c, params, n_concepts=C, n_classes=K,
                        temperature=temperature)

    assert preds.shape == (B, K), preds.shape
    assert preds.dtype == jnp.float32
    max_err = float(jnp.max(jnp.abs(preds - ref)))
    assert jnp.allclose(preds, ref, atol=atol, rtol=rtol), (max_err, atol)


if __name__ == "__main__":
    root = jax.random.PRNGKey(0)
    k1, k2, k3, k4 = jax.random.split(root, 4)

    # Exact-semantics check: f32 matmuls, fused block-diagonal w2 path (E < 128).
    _run_case(k1, B=8, emb=32, C=8, K=4, temperature=1.0,
              matmul_dtype=jnp.float32, atol=1e-5, rtol=1e-5)
    # Default config: bf16 MXU matmuls (tolerance reflects bf16 operands).
    _run_case(k2, B=8, emb=32, C=8, K=4, temperature=1.0,
              matmul_dtype=jnp.bfloat16, atol=3e-2)
    # Split-w2 path (E >= 128) with a multi-step batch grid.
    _run_case(k3, B=16, emb=128, C=8, K=4, temperature=1.0,
              matmul_dtype=jnp.float32, atol=1e-5, rtol=1e-5)
    # General-temperature path (per-class logsumexp via roll-max fold).
    _run_case(k4, B=8, emb=32, C=8, K=4, temperature=0.7,
              matmul_dtype=jnp.float32, atol=1e-4)

    print("KERNEL_OK")
</pallas_src>

<mosaic_0001>
module attributes {stable_mosaic.version = 11 : i64} {
  func.func @_crl_kernel(%arg0: i32, %arg1: memref<8x32xf32, #tpu.memory_space<vmem>>, %arg2: memref<8x8xf32, #tpu.memory_space<vmem>>, %arg3: memref<32x64xf32, #tpu.memory_space<vmem>>, %arg4: memref<1x64xf32, #tpu.memory_space<vmem>>, %arg5: memref<64x64xf32, #tpu.memory_space<vmem>>, %arg6: memref<1x64xf32, #tpu.memory_space<vmem>>, %arg7: memref<8x32xf32, #tpu.memory_space<vmem>>, %arg8: memref<32x4xf32, #tpu.memory_space<vmem>>, %arg9: memref<4x32xf32, #tpu.memory_space<vmem>>, %arg10: memref<8x128xf32, #tpu.memory_space<vmem>>) attributes {dimension_semantics = [#tpu.dimension_semantics<parallel>], iteration_bounds = array<i64: 1>, scalar_prefetch = 0 : i64, scratch_operands = 0 : i64, tpu.core_type = #tpu.core_type<tc>, window_params = [{transform_indices = @transform_0, window_bounds = array<i64: 8, 32>}, {transform_indices = @transform_1, window_bounds = array<i64: 8, 8>}, {pipeline_mode = #tpu.pipeline_mode<synchronous>, transform_indices = @transform_2, window_bounds = array<i64: 32, 64>}, {pipeline_mode = #tpu.pipeline_mode<synchronous>, transform_indices = @transform_3, window_bounds = array<i64: 1, 64>}, {pipeline_mode = #tpu.pipeline_mode<synchronous>, transform_indices = @transform_4, window_bounds = array<i64: 64, 64>}, {pipeline_mode = #tpu.pipeline_mode<synchronous>, transform_indices = @transform_5, window_bounds = array<i64: 1, 64>}, {pipeline_mode = #tpu.pipeline_mode<synchronous>, transform_indices = @transform_6, window_bounds = array<i64: 8, 32>}, {pipeline_mode = #tpu.pipeline_mode<synchronous>, transform_indices = @transform_7, window_bounds = array<i64: 32, 4>}, {pipeline_mode = #tpu.pipeline_mode<synchronous>, transform_indices = @transform_8, window_bounds = array<i64: 4, 32>}, {transform_indices = @transform_9, window_bounds = array<i64: 8, 128>}]} {
    %c0 = arith.constant 0 : index
    %c0_0 = arith.constant 0 : index
    %0 = vector.load %arg1[%c0, %c0_0] : memref<8x32xf32, #tpu.memory_space<vmem>>, vector<8x32xf32>
    %c0_1 = arith.constant 0 : index
    %c0_2 = arith.constant 0 : index
    %1 = vector.load %arg2[%c0_1, %c0_2] : memref<8x8xf32, #tpu.memory_space<vmem>>, vector<8x8xf32>
    %c0_3 = arith.constant 0 : index
    %c0_4 = arith.constant 0 : index
    %2 = vector.load %arg3[%c0_3, %c0_4] : memref<32x64xf32, #tpu.memory_space<vmem>>, vector<32x64xf32>
    %cst = arith.constant dense<0.000000e+00> : vector<8x64xf32>
    %3 = tpu.matmul %0, %2, %cst {dimension_numbers = #tpu.dot_dimension_numbers<[1], [0], [0], [1], [0, 0, 1, 1], [], []>} : vector<8x32xf32>, vector<32x64xf32>, vector<8x64xf32> -> vector<8x64xf32>
    %c0_5 = arith.constant 0 : index
    %c0_6 = arith.constant 0 : index
    %4 = vector.load %arg4[%c0_5, %c0_6] : memref<1x64xf32, #tpu.memory_space<vmem>>, vector<1x64xf32>
    %5 = vector.broadcast %4 : vector<1x64xf32> to vector<8x64xf32>
    %6 = arith.addf %3, %5 : vector<8x64xf32>
    %cst_7 = arith.constant 0.00999999977 : f32
    %7 = vector.broadcast %cst_7 : f32 to vector<8x64xf32>
    %8 = arith.mulf %7, %6 : vector<8x64xf32>
    %9 = arith.maximumf %6, %8 : vector<8x64xf32>
    %c0_8 = arith.constant 0 : index
    %c0_9 = arith.constant 0 : index
    %10 = vector.load %arg5[%c0_8, %c0_9] : memref<64x64xf32, #tpu.memory_space<vmem>>, vector<64x64xf32>
    %cst_10 = arith.constant dense<0.000000e+00> : vector<8x64xf32>
    %11 = tpu.matmul %9, %10, %cst_10 {dimension_numbers = #tpu.dot_dimension_numbers<[1], [0], [0], [1], [0, 0, 1, 1], [], []>} : vector<8x64xf32>, vector<64x64xf32>, vector<8x64xf32> -> vector<8x64xf32>
    %c0_11 = arith.constant 0 : index
    %c0_12 = arith.constant 0 : index
    %12 = vector.load %arg6[%c0_11, %c0_12] : memref<1x64xf32, #tpu.memory_space<vmem>>, vector<1x64xf32>
    %13 = vector.broadcast %12 : vector<1x64xf32> to vector<8x64xf32>
    %14 = arith.addf %11, %13 : vector<8x64xf32>
    %15 = vector.extract_strided_slice %14 {offsets = [0, 0], sizes = [8, 32], strides = [1, 1]} : vector<8x64xf32> to vector<8x32xf32>
    %16 = vector.extract_strided_slice %14 {offsets = [0, 32], sizes = [8, 32], strides = [1, 1]} : vector<8x64xf32> to vector<8x32xf32>
    %17 = arith.negf %15 : vector<8x32xf32>
    %18 = math.exp %17 : vector<8x32xf32>
    %cst_13 = arith.constant 1.000000e+00 : f32
    %19 = vector.broadcast %cst_13 : f32 to vector<8x32xf32>
    %20 = arith.addf %19, %18 : vector<8x32xf32>
    %21 = arith.divf %19, %20 : vector<8x32xf32>
    %c0_14 = arith.constant 0 : index
    %c0_15 = arith.constant 0 : index
    %22 = vector.load %arg7[%c0_14, %c0_15] : memref<8x32xf32, #tpu.memory_space<vmem>>, vector<8x32xf32>
    %cst_16 = arith.constant dense<0.000000e+00> : vector<8x32xf32>
    %23 = tpu.matmul %1, %22, %cst_16 {dimension_numbers = #tpu.dot_dimension_numbers<[1], [0], [0], [1], [0, 0, 1, 1], [], []>} : vector<8x8xf32>, vector<8x32xf32>, vector<8x32xf32> -> vector<8x32xf32>
    %c0_17 = arith.constant 0 : index
    %c0_18 = arith.constant 0 : index
    %24 = vector.load %arg8[%c0_17, %c0_18] : memref<32x4xf32, #tpu.memory_space<vmem>>, vector<32x4xf32>
    %cst_19 = arith.constant dense<0.000000e+00> : vector<8x4xf32>
    %25 = tpu.matmul %16, %24, %cst_19 {dimension_numbers = #tpu.dot_dimension_numbers<[1], [0], [0], [1], [0, 0, 1, 1], [], []>} : vector<8x32xf32>, vector<32x4xf32>, vector<8x4xf32> -> vector<8x4xf32>
    %cst_20 = arith.constant 1.250000e-01 : f32
    %26 = vector.broadcast %cst_20 : f32 to vector<8x4xf32>
    %27 = arith.mulf %25, %26 : vector<8x4xf32>
    %c0_21 = arith.constant 0 : index
    %c0_22 = arith.constant 0 : index
    %28 = vector.load %arg9[%c0_21, %c0_22] : memref<4x32xf32, #tpu.memory_space<vmem>>, vector<4x32xf32>
    %cst_23 = arith.constant dense<0.000000e+00> : vector<8x32xf32>
    %29 = tpu.matmul %27, %28, %cst_23 {dimension_numbers = #tpu.dot_dimension_numbers<[1], [0], [0], [1], [0, 0, 1, 1], [], []>} : vector<8x4xf32>, vector<4x32xf32>, vector<8x32xf32> -> vector<8x32xf32>
    %30 = arith.subf %29, %16 : vector<8x32xf32>
    %31 = arith.negf %30 : vector<8x32xf32>
    %32 = math.exp %31 : vector<8x32xf32>
    %cst_24 = arith.constant 1.000000e+00 : f32
    %33 = vector.broadcast %cst_24 : f32 to vector<8x32xf32>
    %34 = arith.addf %33, %32 : vector<8x32xf32>
    %35 = arith.divf %33, %34 : vector<8x32xf32>
    %cst_25 = arith.constant 1.000000e+00 : f32
    %36 = vector.broadcast %cst_25 : f32 to vector<8x32xf32>
    %37 = arith.subf %36, %21 : vector<8x32xf32>
    %38 = arith.maximumf %37, %23 : vector<8x32xf32>
    %cst_26 = arith.constant 1.000000e+00 : f32
    %39 = vector.broadcast %cst_26 : f32 to vector<8x32xf32>
    %40 = arith.subf %39, %23 : vector<8x32xf32>
    %41 = arith.maximumf %21, %40 : vector<8x32xf32>
    %42 = arith.minimumf %38, %41 : vector<8x32xf32>
    %43 = arith.maximumf %42, %35 : vector<8x32xf32>
    %cst_27 = arith.constant 1.000000e+00 : f32
    %44 = vector.broadcast %cst_27 : f32 to vector<8x96xf32>
    %45 = tpu.concatenate %43, %44 in 1 : vector<8x32xf32>, vector<8x96xf32> -> vector<8x128xf32>
    %c112_i32 = arith.constant 112 : i32
    %46 = tpu.dynamic_rotate %45 by %c112_i32 dim 1 : vector<8x128xf32>, i32 -> vector<8x128xf32>
    %47 = arith.minimumf %45, %46 : vector<8x128xf32>
    %c120_i32 = arith.constant 120 : i32
    %48 = tpu.dynamic_rotate %47 by %c120_i32 dim 1 : vector<8x128xf32>, i32 -> vector<8x128xf32>
    %49 = arith.minimumf %47, %48 : vector<8x128xf32>
    %c124_i32 = arith.constant 124 : i32
    %50 = tpu.dynamic_rotate %49 by %c124_i32 dim 1 : vector<8x128xf32>, i32 -> vector<8x128xf32>
    %51 = arith.minimumf %49, %50 : vector<8x128xf32>
    %c0_28 = arith.constant 0 : index
    %c0_29 = arith.constant 0 : index
    %52 = vector.load %arg10[%c0_28, %c0_29] : memref<8x128xf32, #tpu.memory_space<vmem>>, vector<8x128xf32>
    tpu.vector_store %arg10[%c0_28, %c0_29], %51 {strides = array<i32>} : memref<8x128xf32, #tpu.memory_space<vmem>>, vector<8x128xf32>,
    return
  }
  func.func @transform_0(%arg0: i32) -> (i32, i32) {
    %c0_i32 = arith.constant 0 : i32
    %c0_i32_0 = arith.constant 0 : i32
    return %arg0, %c0_i32 : i32, i32
  }
  func.func @transform_1(%arg0: i32) -> (i32, i32) {
    %c0_i32 = arith.constant 0 : i32
    %c0_i32_0 = arith.constant 0 : i32
    return %arg0, %c0_i32 : i32, i32
  }
  func.func @transform_2(%arg0: i32) -> (i32, i32) {
    %c0_i32 = arith.constant 0 : i32
    %c0_i32_0 = arith.constant 0 : i32
    %c0_i32_1 = arith.constant 0 : i32
    return %c0_i32, %c0_i32_0 : i32, i32
  }
  func.func @transform_3(%arg0: i32) -> (i32, i32) {
    %c0_i32 = arith.constant 0 : i32
    %c0_i32_0 = arith.constant 0 : i32
    %c0_i32_1 = arith.constant 0 : i32
    return %c0_i32, %c0_i32_0 : i32, i32
  }
  func.func @transform_4(%arg0: i32) -> (i32, i32) {
    %c0_i32 = arith.constant 0 : i32
    %c0_i32_0 = arith.constant 0 : i32
    %c0_i32_1 = arith.constant 0 : i32
    return %c0_i32, %c0_i32_0 : i32, i32
  }
  func.func @transform_5(%arg0: i32) -> (i32, i32) {
    %c0_i32 = arith.constant 0 : i32
    %c0_i32_0 = arith.constant 0 : i32
    %c0_i32_1 = arith.constant 0 : i32
    return %c0_i32, %c0_i32_0 : i32, i32
  }
  func.func @transform_6(%arg0: i32) -> (i32, i32) {
    %c0_i32 = arith.constant 0 : i32
    %c0_i32_0 = arith.constant 0 : i32
    %c0_i32_1 = arith.constant 0 : i32
    return %c0_i32, %c0_i32_0 : i32, i32
  }
  func.func @transform_7(%arg0: i32) -> (i32, i32) {
    %c0_i32 = arith.constant 0 : i32
    %c0_i32_0 = arith.constant 0 : i32
    %c0_i32_1 = arith.constant 0 : i32
    return %c0_i32, %c0_i32_0 : i32, i32
  }
  func.func @transform_8(%arg0: i32) -> (i32, i32) {
    %c0_i32 = arith.constant 0 : i32
    %c0_i32_0 = arith.constant 0 : i32
    %c0_i32_1 = arith.constant 0 : i32
    return %c0_i32, %c0_i32_0 : i32, i32
  }
  func.func @transform_9(%arg0: i32) -> (i32, i32) {
    %c0_i32 = arith.constant 0 : i32
    %c0_i32_0 = arith.constant 0 : i32
    return %arg0, %c0_i32 : i32, i32
  }
}

</mosaic_0001>

<bundles_post_ra>
// kernel: crl_forward.1
= control target key start
LH: loop header
LB: loop body
LE: loop exit
PB: predicated region body
PF: predicated region fallthrough
CT: control target
= control target key end

     0   :  { %14 = vsyncpa [#allocation3], 0  ;;  %s832_s0 = inlined_call_operand.vmem [shape: f32[8,32], index: 0, kind: input, shape index: {}]   ;;  %s833_s1 = inlined_call_operand.hbm [shape: f32[8,8], index: 1, kind: input, shape index: {}]   ;;  %s834_s2 = inlined_call_operand.vmem [shape: f32[32,64], index: 2, kind: input, shape index: {}]   ;;  %s835_s3 = inlined_call_operand.vmem [shape: f32[1,64], index: 3, kind: input, shape index: {}]   ;;  %s836_s4 = inlined_call_operand.hbm [shape: f32[64,64], index: 4, kind: input, shape index: {}]   ;;  %s837_s5 = inlined_call_operand.vmem [shape: f32[1,64], index: 5, kind: input, shape index: {}]   ;;  %s838_s6 = inlined_call_operand.vmem [shape: f32[8,32], index: 6, kind: input, shape index: {}]   ;;  %s839_s7 = inlined_call_operand.vmem [shape: f32[32,4], index: 7, kind: input, shape index: {}]   ;;  %s840_s8 = inlined_call_operand.vmem [shape: f32[4,32], index: 8, kind: input, shape index: {}]   ;;  %s841_s9 = inlined_call_operand.vmem [shape: f32[8,128], index: 9, kind: output, shape index: {}]  }
   0x1   :  { %15 = vsyncpa [#allocation5], 0  ;;  %s682_s30 = smov [#allocation2]   ;;  %s683_s11 = smov [#allocation4]  }
   0x2   :  { %s24_s10 = sshll.u32 %s682_s30, 4  ;;  %s37_s12 = sshll.u32 %s683_s11, 4  ;;  %s25_s10 = int_to_ptr.vmem [resolvable:$true] %s24_s10  ;;  %s743_s12 = int_to_ptr.vmem [resolvable:$true] %s37_s12 }
   0x3   :  { %s634_s15 = scalar_lea.hbm %s833_s1, 128 }
   0x4   :  { %p635_p0 = scmp.ne.s32.totalorder %s833_s1, %s634_s15  ;;  %p638_p1 = scmp.lt.u32.totalorder %s634_s15, %s833_s1 }
   0x6   :  { %p640_p2 = pnand %p638_p1, %p635_p0 }
   0x8   :  { %643 = shalt.err (!%p640_p2)
}
   0x9   :  { %s644_s20 = scalar_lea.vmem %s25_s10, 128  ;;  %p649_p4 = scmp.lt.s32.totalorder %s25_s10, %s25_s10 }
   0xa   :  { %p645_p3 = scmp.ne.s32.totalorder %s25_s10, %s644_s20  ;;  %p650_p5 = scmp.lt.s32.totalorder %s644_s20, %s644_s20 }
   0xc   :  { %p651_p6 = por %p650_p5, %p649_p4 }
   0xe   :  { %p652_p7 = pnand %p651_p6, %p645_p3 }
  0x10   :  { %655 = shalt.err (!%p652_p7)
}
  0x11   :  { %27 = dma.hbm_to_vmem [thread:$0]  %s833_s1, 128, %s25_s10, [#allocation3]  }
  0x12   :  { %s656_s25 = scalar_lea.hbm %s836_s4, 1024 }
  0x13   :  { %p657_p8 = scmp.ne.s32.totalorder %s836_s4, %s656_s25  ;;  %p660_p9 = scmp.lt.u32.totalorder %s656_s25, %s836_s4 }
  0x15   :  { %p662_p10 = pnand %p660_p9, %p657_p8 }
  0x17   :  { %665 = shalt.err (!%p662_p10)
}
  0x18   :  { %s666_s30 = scalar_lea.vmem %s743_s12, 1024  ;;  %p671_p12 = scmp.lt.s32.totalorder %s743_s12, %s743_s12 }
  0x19   :  { %p667_p11 = scmp.ne.s32.totalorder %s743_s12, %s666_s30  ;;  %p672_p13 = scmp.lt.s32.totalorder %s666_s30, %s666_s30 }
  0x1b   :  { %p673_p0 = por %p672_p13, %p671_p12 }
  0x1d   :  { %p674_p1 = pnand %p673_p0, %p667_p11 }
  0x1f   :  { %677 = shalt.err (!%p674_p1)
}
  0x20   :  { %s684_s1 = smov 128   ;;  %s685_s10 = smov 8  }
  0x21   :  { %43 = dma.hbm_to_vmem [thread:$0]  %s836_s4, 1024, %s743_s12, [#allocation5], %s684_s1, %s684_s1, %s685_s10  }
  0x22   :  { %678 = dma.done.wait [#allocation3], 128  }
  0x23   :  { %679 = vsyncadd [#allocation3], 4294967168 }
  0x24   :  { %680 = dma.done.wait [#allocation5], 1024  }
  0x25   :  { %681 = vsyncadd [#allocation5], 4294966272  ;;  %v686_v0 = vmov 0.0|0.0   ;;  %vm687_vm0 = vmmov 0   ;;  %v688_v1 = vmov 0.0   ;;  %v60_v2 = vld [vmem:[%s834_s2] sm:$0xff] }
  0x26   :  { %591 = vmatprep.subr.bf16.mxu0 %v686_v0  ;;  %548 = vmatprep.mubr.msk.f32.mxu0 %vm687_vm0, %v688_v1  ;;  %v61_v3 = vld [vmem:[%s834_s2 + $0x8] sm:$0xff]  ;;  %v62_v4 = vld [vmem:[%s834_s2 + $0x10] sm:$0xff]  ;;  %v63_v6 = vld [vmem:[%s834_s2 + $0x18] sm:$0xff]  ;;  %vm71_vm1 = vcmask 261120   ;;  %vm243_vm2 = vcmask 64512   ;;  %vm162_vm3 = vcmask 523264  }
  0x27   :  { %597 = vmatprep.subr.bf16.mxu1 %v686_v0  ;;  %567 = vmatprep.mubr.msk.f32.mxu1 %vm687_vm0, %v688_v1  ;;  %v592_v5 = vpack.c.bf16 %v61_v3, %v60_v2  ;;  %v147_v7 = vld [vmem:[#allocation4] sm:$0xff]  ;;  %v148_v8 = vld [vmem:[#allocation4 + $0x8] sm:$0xff]  ;;  %v149_v9 = vld [vmem:[#allocation4 + $0x10] sm:$0xff]  ;;  %v595_v11 = vpack.c.bf16 %v63_v6, %v62_v4  ;;  %vm402_vm4 = vcmask 1043456   ;;  %vm398_vm5 = vcmask 31744   ;;  %s692_s13 = smov 124  }
  0x28   :  { %v150_v10 = vld [vmem:[#allocation4 + $0x18] sm:$0xff]  ;;  %v598_v12 = vpack.c.bf16 %v148_v8, %v147_v7  ;;  %v151_v15 = vld [vmem:[#allocation4 + $0x20] sm:$0xff]  ;;  %v152_v16 = vld [vmem:[#allocation4 + $0x28] sm:$0xff] }
  0x29   :  { %593 = vmatpush3.bf16.msra.mxu0 %v592_v5  ;;  %v601_v13 = vpack.c.bf16 %v150_v10, %v149_v9  ;;  %v58_v14 = vld [vmem:[%s832_s0] sm:$0xff]  ;;  %v604_v17 = vpack.c.bf16 %v152_v16, %v151_v15  ;;  %v153_v18 = vld [vmem:[#allocation4 + $0x30] sm:$0xff]  ;;  %v318_v32 = vld [vmem:[%s839_s7 + $0x8] sm:$0xff] }
  0x2a   :  { %594 = vmatprep.subr.bf16.mxu0 %v686_v0  ;;  %599 = vmatpush3.bf16.msra.mxu1 %v598_v12  ;;  %v154_v19 = vld [vmem:[#allocation4 + $0x38] sm:$0xff]  ;;  %v319_v33 = vld [vmem:[%s839_s7 + $0x10] sm:$0xff]  ;;  %v320_v35 = vld [vmem:[%s839_s7 + $0x18] sm:$0xff] }
  0x2b   :  { %600 = vmatprep.subr.bf16.mxu1 %v686_v0  ;;  %v607_v20 = vpack.c.bf16 %v154_v19, %v153_v18  ;;  %v242_v21 = vld [vmem:[%s838_s6] sm:$0xff]  ;;  %v613_v36 = vpack.c.bf16 %v320_v35, %v319_v33 }
  0x2c   :  { %v59_v22 = vld [vmem:[#allocation2] sm:$0xff] }
  0x2d   :  { %596 = vmatpush3.bf16.msra.mxu0 %v595_v11  ;;  %v507_v23 = vld [vmem:[%s835_s3] ss:$0 sm:$0xff] }
  0x2e   :  { %570 = vmatprep.subr.mxu0 %v688_v1  ;;  %602 = vmatpush3.bf16.msra.mxu1 %v601_v13  ;;  %v317_v31 = vld [vmem:[%s839_s7] sm:$0xff]  ;;  %s689_s7 = smov 96  }
  0x2f   :  { %603 = vmatprep.subr.bf16.mxu1 %v686_v0  ;;  %v610_v34 = vpack.c.bf16 %v318_v32, %v317_v31  ;;  %v397_v37 = vld [vmem:[%s840_s8] sm:$0xf]  ;;  %s691_s8 = smov 120  }
  0x30   :  { %549 = vmatmul.mubr.msk.f32.vlgmr.msra.gmra.mrb[0].mxu0 %vm71_vm1, %v58_v14  ;;  %v509_v38 = vld [vmem:[%s837_s5] ss:$0 sm:$0xff]  ;;  %s690_s5 = smov 112  }
  0x31   :  { %572 = vmatprep.mubr.msk.f32.mxu0 %vm687_vm0, %v688_v1  ;;  %571 = vmatpush3.msra.mxu0 %v242_v21 }
  0x32   :  { %605 = vmatpush3.bf16.msra.mxu1 %v604_v17  ;;  %609 = vmatprep.subr.bf16.mxu0 %v686_v0 }
  0x33   :  { %606 = vmatprep.subr.bf16.mxu1 %v686_v0 }
  0x34   :  { %573 = vmatmul.mubr.msk.f32.vlgmr.msra.gmra.mrb[2].mxu0 %vm243_vm2, %v59_v22 }
  0x35   :  { %583 = vmatprep.mubr.msk.f32.mxu0 %vm687_vm0, %v688_v1  ;;  %611 = vmatpush3.bf16.msra.mxu0 %v610_v34 }
  0x36   :  { %608 = vmatpush3.bf16.msra.mxu1 %v607_v20  ;;  %612 = vmatprep.subr.bf16.mxu0 %v686_v0 }
  0x37   :  { %586 = vmatprep.subr.mxu1 %v688_v1 }
  0x39   :  { %614 = vmatpush3.bf16.msra.mxu0 %v613_v36 }
 0x103   :  { %v141_v24 = vpop.f32.mrb[0].mxu0 }
 0x104   :  { %v142_v25 = vadd.f32 %v507_v23, %v141_v24  ;;  %v550_v26 = vpop.f32.mrb[1].mxu0 }
 0x106   :  { %v145_v27 = vmul.f32 0.01, %v142_v25 }
 0x107   :  { %v313_v29 = vpop.f32.mrb[2].mxu0 }
 0x108   :  { %v146_v28 = vmax.f32 %v142_v25, %v145_v27  ;;  %v574_v30 = vpop.f32.mrb[3].mxu0  ;;  %v486_v45 = vsub.f32 1.0, %v313_v29 }
 0x10a   :  { %568 = vmatmul.mubr.msk.f32.vlgmr.msra.gmra.mrb[0].mxu1 %vm162_vm3, %v146_v28 }
 0x10b   :  { %588 = vmatprep.mubr.msk.f32.mxu1 %vm687_vm0, %v688_v1  ;;  %587 = vmatpush3.msk.msra.mxu1 %vm402_vm4, %v397_v37 }
 0x1dd   :  { %v232_v39 = vpop.f32.mrb[0].mxu1 }
 0x1de   :  { %v233_v40 = vadd.f32 %v509_v38, %v232_v39  ;;  %v569_v41 = vpop.f32.mrb[1].mxu1 }
 0x1e0   :  { %v511_v42 = vmul.f32 -1.442695, %v233_v40  ;;  %322 = vrot.lane.b32.xlu0 %v233_v40, %s689_s7 }
 0x1e2   :  { %626 = vpow2.f32 %v511_v42 }
 0x1ec   :  { %v627_v43 = vpop.eup %626 }
 0x1ed   :  { %v239_v44 = vadd.f32 1.0, %v627_v43 }
 0x1ef   :  { %628 = vrcp.f32 %v239_v44 }
 0x1f9   :  { %v629_v46 = vpop.eup %628 }
 0x1fa   :  { %v484_v47 = vsub.f32 1.0, %v629_v46  ;;  %v487_v48 = vmax.f32 %v629_v46, %v486_v45 }
 0x1fc   :  { %v485_v49 = vmax.f32 %v484_v47, %v313_v29 }
 0x1fe   :  { %v488_v50 = vmin.f32 %v485_v49, %v487_v48 }
 0x252   :  { %v323_v51 = vpop.permute.xlu0 %322 }
 0x253   :  { %584 = vmatmul.mubr.msk.f32.vlgmr.msra.gmra.mrb[4].mxu0 %vm71_vm1, %v323_v51 }
 0x326   :  { %v392_v52 = vpop.f32.mrb[4].mxu0 }
 0x327   :  { %v396_v53 = vmul.f32 0.125, %v392_v52  ;;  %v585_v54 = vpop.f32.mrb[5].mxu0 }
 0x329   :  { %589 = vmatmul.mubr.msk.f32.vlgmr.msra.gmra.mrb[2].mxu1 %vm398_vm5, %v396_v53 }
 0x3fc   :  { %v472_v55 = vpop.f32.mrb[2].mxu1 }
 0x3fd   :  { %v477_v56 = vsub.f32 %v472_v55, %v323_v51  ;;  %v590_v57 = vpop.f32.mrb[3].mxu1 }
 0x3ff   :  { %v516_v58 = vmul.f32 -1.442695, %v477_v56 }
 0x401   :  { %630 = vpow2.f32 %v516_v58 }
 0x40b   :  { %v631_v59 = vpop.eup %630 }
 0x40c   :  { %v481_v60 = vadd.f32 1.0, %v631_v59 }
 0x40e   :  { %632 = vrcp.f32 %v481_v60 }
 0x418   :  { %v633_v61 = vpop.eup %632 }
 0x419   :  { %v489_v62 = vmax.f32 %v488_v50, %v633_v61 }
 0x41b   :  { %v490_v63 = vsel %vm71_vm1, %v489_v62, 1.0 }
 0x41c   :  { %491 = vrot.lane.b32.xlu0 %v490_v63, %s690_s5 }
 0x48e   :  { %v492_v0 = vpop.permute.xlu0 %491 }
 0x48f   :  { %v493_v1 = vmin.f32 %v490_v63, %v492_v0 }
 0x491   :  { %494 = vrot.lane.b32.xlu1 %v493_v1, %s691_s8 }
 0x503   :  { %v495_v2 = vpop.permute.xlu1 %494 }
 0x504   :  { %v496_v3 = vmin.f32 %v493_v1, %v495_v2 }
 0x506   :  { %497 = vrot.lane.b32.xlu1 %v496_v3, %s692_s13 }
 0x578   :  { %v498_v4 = vpop.permute.xlu1 %497 }
 0x579   :  { %v499_v5 = vmin.f32 %v496_v3, %v498_v4 }
 0x57b   :  { %500 = vst [vmem:[%s841_s9] sm:$0xff] %v499_v5 }
 0x57c   :  { %505 = vsyncpa [#allocation3], 1 }
 0x57d   :  { %506 = vsyncpa [#allocation5], 1 }

</bundles_post_ra>
